<compile_context>
chip_gen: v6e
topology: v6e:2x2x1
jax: 0.10.0
libtpu: 0.0.40
codegen_flags: <defaults>
</compile_context>

<pallas_src>
import math
import functools

import jax
import jax.numpy as jnp
from jax.experimental import pallas as pl
from jax.experimental.pallas import tpu as pltpu

# physical unit used by the original module
MM = 1e-3
BASE_PLANE_THICKNESS = 2 * MM

# Sentinel folded into the loss-exponent plane where the aperture mask == 0:
# exp(k * _MASK_NEG) underflows to exactly 0.0 in float32 for any physical k>0.
_MASK_NEG = jnp.float32(-1e30)


def tau_iter(iter_frac, tau_min=0.5, tau_max=3.0, r=None):
    if r is None:
        r = math.log(tau_max / tau_min)
    return max(tau_min, tau_max * math.exp(-r * iter_frac))


def _pick_tile_h(H, max_tile=256):
    """Spatial tile along H: multiple of 8 (or the full extent) that fits VMEM."""
    if H <= max_tile:
        return H
    for th in (256, 128, 64, 32, 16, 8):
        if th <= max_tile and H % th == 0:
            return th
    return max_tile  # ragged last block handled by cdiv grid + masked writes


# ---------------------------------------------------------------------------
# Kernel 1: hard Gumbel-softmax quantization + tolerance noise (L-invariant,
# runs once).  logits are K-major (K, H, W); unrolled running-max / running-
# LUT-value scan keeps everything lane-dense on the VPU (no XLU reductions,
# handles arbitrary LUTs, strict '>' preserves torch-argmax first-index ties).
# ---------------------------------------------------------------------------
def _quantize_kernel(lut_ref, logits_ref, noise_ref, h_ref, *, holo_level):
    best = logits_ref[0]                                 # (TH, W)
    val = jnp.zeros_like(best) + lut_ref[0]
    for j in range(1, holo_level):                       # static tiny loop
        zj = logits_ref[j]
        upd = zj > best                                  # strict > : first max wins
        best = jnp.where(upd, zj, best)
        val = jnp.where(upd, lut_ref[j], val)
    h_ref[...] = val + noise_ref[...]                    # + height tolerance noise


def quantize_height_map(logits_khw, lut, noise, *, tile_h=None):
    K, H, W = logits_khw.shape
    th = _pick_tile_h(H) if tile_h is None else tile_h
    kernel = functools.partial(_quantize_kernel, holo_level=K)
    return pl.pallas_call(
        kernel,
        out_shape=jax.ShapeDtypeStruct((H, W), jnp.float32),
        grid_spec=pltpu.PrefetchScalarGridSpec(
            num_scalar_prefetch=0,
            grid=(pl.cdiv(H, th),),
            in_specs=[
                pl.BlockSpec(memory_space=pltpu.MemorySpace.SMEM),     # lut (K,)
                pl.BlockSpec((K, th, W), lambda h: (0, h, 0)),         # logits (K,H,W)
                pl.BlockSpec((th, W), lambda h: (h, 0)),               # tolerance noise
            ],
            out_specs=pl.BlockSpec((th, W), lambda h: (h, 0)),
        ),
        compiler_params=pltpu.CompilerParams(dimension_semantics=("parallel",)),
    )(lut, logits_khw, noise)


# ---------------------------------------------------------------------------
# Kernel 2: per-(H-tile, wavelength) phase-shift + complex modulation.
# Body reduces to: loss = exp(k*C), theta = k*A, cos/sin, complex multiply.
# ---------------------------------------------------------------------------
def _modulate_kernel(wl_ref, a_ref, c_ref, fre_ref, fim_ref, ore_ref, oim_ref):
    l = pl.program_id(1)
    k_w = 2.0 * jnp.pi / wl_ref[l]

    loss = jnp.exp(k_w * c_ref[...])           # (TH, W); == 0 where mask folded in
    theta = k_w * a_ref[...]
    mr = loss * jnp.cos(theta)                 # Re{loss * exp(-i*theta)}
    mi = -loss * jnp.sin(theta)                # Im{loss * exp(-i*theta)}

    fr = fre_ref[...]                          # (B, TH, W) -- L dim squeezed
    fi = fim_ref[...]
    ore_ref[...] = fr * mr - fi * mi
    oim_ref[...] = fr * mi + fi * mr


def holo_modulate_pallas(logits_khw, lut, noise, mask, wavelengths, epsilon,
                         tand, field_re, field_im, *, tile_h=None):
    """Fused GumbelQuantizedHologramLayer forward.

    Returns planar (out_re, out_im), each float32 (B, L, H, W)."""
    B, L, H, W = field_re.shape
    th = _pick_tile_h(H) if tile_h is None else tile_h

    wavelengths = jnp.asarray(wavelengths, jnp.float32).reshape(-1)
    lut = jnp.asarray(lut, jnp.float32)

    # --- L-invariant: quantized + noised height map (one Pallas pass) -------
    h_map = quantize_height_map(logits_khw, lut, noise, tile_h=th)     # (H, W)

    # --- L-invariant planes (cheap fused elementwise prologue over (H,W)) ---
    sqrt_eps = jnp.sqrt(jnp.float32(epsilon))
    hb = h_map + jnp.float32(BASE_PLANE_THICKNESS)
    a_plane = hb * (sqrt_eps - 1.0) + jnp.max(h_map)                   # theta / k
    c_plane = -0.5 * hb * jnp.float32(tand) * sqrt_eps                 # log(loss) / k
    c_plane = jnp.where(mask > 0, c_plane, _MASK_NEG)                  # fold aperture

    # --- per-(H tile, wavelength) modulation --------------------------------
    out_shape = (jax.ShapeDtypeStruct((B, L, H, W), jnp.float32),
                 jax.ShapeDtypeStruct((B, L, H, W), jnp.float32))

    field_spec = pl.BlockSpec((B, None, th, W), lambda h, l: (0, l, h, 0))
    plane_spec = pl.BlockSpec((th, W), lambda h, l: (h, 0))

    grid_spec = pltpu.PrefetchScalarGridSpec(
        num_scalar_prefetch=0,
        grid=(pl.cdiv(H, th), L),          # L innermost: A/C tiles not re-DMA'd per l
        in_specs=[
            pl.BlockSpec(memory_space=pltpu.MemorySpace.SMEM),   # wavelengths (L,)
            plane_spec,                                          # A plane
            plane_spec,                                          # C plane (mask folded)
            field_spec,                                          # field real
            field_spec,                                          # field imag
        ],
        out_specs=(
            pl.BlockSpec((B, None, th, W), lambda h, l: (0, l, h, 0)),
            pl.BlockSpec((B, None, th, W), lambda h, l: (0, l, h, 0)),
        ),
    )

    out_re, out_im = pl.pallas_call(
        _modulate_kernel,
        out_shape=out_shape,
        grid_spec=grid_spec,
        compiler_params=pltpu.CompilerParams(
            dimension_semantics=("parallel", "parallel")),
    )(wavelengths, a_plane, c_plane, field_re, field_im)

    return out_re, out_im


# ---------------------------------------------------------------------------
# Plain-JAX glue reproducing the module's parameter setup / sampling
# ---------------------------------------------------------------------------
def prepare_inputs(key, *, holo_size, holo_level, height_constraint_max,
                   tolerance, spacing, circ_aperture, iter_frac):
    H, W = holo_size
    k_weight, k_gumbel, k_noise = jax.random.split(key, 3)

    # nn.Parameter(torch.rand(H, W, holo_level))
    weight_hwk = jax.random.uniform(k_weight, (H, W, holo_level),
                                    dtype=jnp.float32)

    # look_up_table = linspace(0, max, level+1)[:-1]
    lut = jnp.linspace(0.0, height_constraint_max, holo_level + 1,
                       dtype=jnp.float32)[:-1]

    # tau only rescales (logits + gumbels); with hard=True the forward one-hot
    # is tau-invariant, but we reproduce the scaling anyway.
    tau = tau_iter(iter_frac) if iter_frac is not None else 1.0
    gumbels = jax.random.gumbel(k_gumbel, weight_hwk.shape, dtype=jnp.float32)
    logits_hwk = (weight_hwk + gumbels) / jnp.float32(tau)
    # K-major layout for the TPU kernel (one-time parameter-prep transpose).
    logits_khw = jnp.transpose(logits_hwk, (2, 0, 1))

    # add_height_map_noise: (rand - 0.5) * 2 * tolerance
    noise = (jax.random.uniform(k_noise, (H, W), dtype=jnp.float32) - 0.5) \
            * 2.0 * tolerance

    # add_circ_aperture_to_field
    if circ_aperture:
        dx, dy = spacing
        r = max(dx * H, dy * W) / 2.0
        x = jnp.linspace(-dx * H / 2, dx * H / 2, H, dtype=jnp.float32)
        y = jnp.linspace(-dy * W / 2, dy * W / 2, W, dtype=jnp.float32)
        X, Y = jnp.meshgrid(x, y, indexing="ij")
        R = jnp.sqrt(X ** 2 + Y ** 2)
        mask = jnp.where(R <= r, 1.0, 0.0).astype(jnp.float32)
    else:
        mask = jnp.ones((H, W), jnp.float32)

    # TODO(synk): num_unit != None path (_copy_quad_to_full + tiled repeat of a
    # unit cell) is not implemented; only the default num_unit=None path is.
    return logits_hwk, logits_khw, lut, noise, mask


def reference_forward(logits_hwk, lut, noise, mask, wavelengths, epsilon, tand,
                      field_re, field_im):
    """Pure-JAX reference mirroring the PyTorch forward (for verification)."""
    idx = jnp.argmax(logits_hwk, axis=-1)
    height = lut[idx] + noise                                     # (H, W)
    lam = jnp.asarray(wavelengths, jnp.float32).reshape(-1)[:, None, None]
    k = 2.0 * jnp.pi / lam
    hb = height[None] + BASE_PLANE_THICKNESS
    loss = jnp.exp(-0.5 * k * hb * tand * jnp.sqrt(epsilon))
    phase = jnp.exp(-1j * (k * hb * (jnp.sqrt(epsilon) - 1.0)
                           + k * jnp.max(height)))
    ps = loss * phase                                             # (L, H, W)
    field = field_re + 1j * field_im                              # (B, L, H, W)
    return mask[None, None] * field * ps[None]


# ---------------------------------------------------------------------------
if __name__ == "__main__":
    # small synthetic configuration
    B, L = 2, 2                    # batch, wavelengths
    H, W = 16, 16                  # hologram spatial size (use W % 128 == 0 at scale)
    HOLO_LEVEL = 6                 # quantization levels
    height_constraint_max = 1.0 * MM
    tolerance = 0.1 * MM
    material = (2.56, 0.01)        # (epsilon, tand)
    spacing = (0.5 * MM, 0.5 * MM)
    wavelengths = jnp.array([3.0 * MM, 4.0 * MM], jnp.float32)
    iter_frac = 0.25

    key = jax.random.PRNGKey(0)
    k_param, k_fr, k_fi = jax.random.split(key, 3)

    logits_hwk, logits_khw, lut, noise, mask = prepare_inputs(
        k_param, holo_size=(H, W), holo_level=HOLO_LEVEL,
        height_constraint_max=height_constraint_max, tolerance=tolerance,
        spacing=spacing, circ_aperture=True, iter_frac=iter_frac)

    field_re = jax.random.normal(k_fr, (B, L, H, W), jnp.float32)
    field_im = jax.random.normal(k_fi, (B, L, H, W), jnp.float32)

    # sanity-check the quantization kernel on its own
    h_map = jax.block_until_ready(quantize_height_map(logits_khw, lut, noise))
    h_ref = lut[jnp.argmax(logits_hwk, axis=-1)] + noise
    assert jnp.allclose(h_map, h_ref, rtol=1e-6, atol=1e-9), "height map mismatch"

    out_re, out_im = holo_modulate_pallas(
        logits_khw, lut, noise, mask, wavelengths,
        material[0], material[1], field_re, field_im)
    out_re = jax.block_until_ready(out_re)
    out_im = jax.block_until_ready(out_im)

    ref = reference_forward(logits_hwk, lut, noise, mask, wavelengths,
                            material[0], material[1], field_re, field_im)
    assert out_re.shape == (B, L, H, W) and out_im.shape == (B, L, H, W)
    assert jnp.allclose(out_re, jnp.real(ref), rtol=1e-4, atol=1e-5), "re mismatch"
    assert jnp.allclose(out_im, jnp.imag(ref), rtol=1e-4, atol=1e-5), "im mismatch"

    print("KERNEL_OK")
</pallas_src>

<mosaic_0001>
module attributes {stable_mosaic.version = 11 : i64} {
  func.func @_quantize_kernel(%arg0: i32, %arg1: memref<6xf32, #tpu.memory_space<smem>>, %arg2: memref<6x16x16xf32, #tpu.memory_space<vmem>>, %arg3: memref<16x16xf32, #tpu.memory_space<vmem>>, %arg4: memref<16x16xf32, #tpu.memory_space<vmem>>) attributes {dimension_semantics = [#tpu.dimension_semantics<parallel>], iteration_bounds = array<i64: 1>, scalar_prefetch = 0 : i64, scratch_operands = 0 : i64, tpu.core_type = #tpu.core_type<tc>, window_params = [{transform_indices = @transform_0, window_bounds = array<i64: 6>}, {transform_indices = @transform_1, window_bounds = array<i64: 6, 16, 16>}, {transform_indices = @transform_2, window_bounds = array<i64: 16, 16>}, {transform_indices = @transform_3, window_bounds = array<i64: 16, 16>}]} {
    %c0 = arith.constant 0 : index
    %c0_0 = arith.constant 0 : index
    %c0_1 = arith.constant 0 : index
    %0 = vector.load %arg2[%c0, %c0_0, %c0_1] : memref<6x16x16xf32, #tpu.memory_space<vmem>>, vector<1x16x16xf32>
    %1 = vector.shape_cast %0 : vector<1x16x16xf32> to vector<16x16xf32>
    %cst = arith.constant 0.000000e+00 : f32
    %2 = vector.broadcast %cst : f32 to vector<16x16xf32>
    %c0_2 = arith.constant 0 : index
    %3 = memref.load %arg1[%c0_2] : memref<6xf32, #tpu.memory_space<smem>>
    %4 = vector.broadcast %3 : f32 to vector<16x16xf32>
    %5 = arith.addf %2, %4 : vector<16x16xf32>
    %c1 = arith.constant 1 : index
    %c0_3 = arith.constant 0 : index
    %c0_4 = arith.constant 0 : index
    %6 = vector.load %arg2[%c1, %c0_3, %c0_4] : memref<6x16x16xf32, #tpu.memory_space<vmem>>, vector<1x16x16xf32>
    %7 = vector.shape_cast %6 : vector<1x16x16xf32> to vector<16x16xf32>
    %8 = arith.cmpf ogt, %7, %1 : vector<16x16xf32>
    %9 = arith.select %8, %7, %1 : vector<16x16xi1>, vector<16x16xf32>
    %c1_5 = arith.constant 1 : index
    %10 = memref.load %arg1[%c1_5] : memref<6xf32, #tpu.memory_space<smem>>
    %11 = vector.broadcast %10 : f32 to vector<16x16xf32>
    %12 = arith.select %8, %11, %5 : vector<16x16xi1>, vector<16x16xf32>
    %c2 = arith.constant 2 : index
    %c0_6 = arith.constant 0 : index
    %c0_7 = arith.constant 0 : index
    %13 = vector.load %arg2[%c2, %c0_6, %c0_7] : memref<6x16x16xf32, #tpu.memory_space<vmem>>, vector<1x16x16xf32>
    %14 = vector.shape_cast %13 : vector<1x16x16xf32> to vector<16x16xf32>
    %15 = arith.cmpf ogt, %14, %9 : vector<16x16xf32>
    %16 = arith.select %15, %14, %9 : vector<16x16xi1>, vector<16x16xf32>
    %c2_8 = arith.constant 2 : index
    %17 = memref.load %arg1[%c2_8] : memref<6xf32, #tpu.memory_space<smem>>
    %18 = vector.broadcast %17 : f32 to vector<16x16xf32>
    %19 = arith.select %15, %18, %12 : vector<16x16xi1>, vector<16x16xf32>
    %c3 = arith.constant 3 : index
    %c0_9 = arith.constant 0 : index
    %c0_10 = arith.constant 0 : index
    %20 = vector.load %arg2[%c3, %c0_9, %c0_10] : memref<6x16x16xf32, #tpu.memory_space<vmem>>, vector<1x16x16xf32>
    %21 = vector.shape_cast %20 : vector<1x16x16xf32> to vector<16x16xf32>
    %22 = arith.cmpf ogt, %21, %16 : vector<16x16xf32>
    %23 = arith.select %22, %21, %16 : vector<16x16xi1>, vector<16x16xf32>
    %c3_11 = arith.constant 3 : index
    %24 = memref.load %arg1[%c3_11] : memref<6xf32, #tpu.memory_space<smem>>
    %25 = vector.broadcast %24 : f32 to vector<16x16xf32>
    %26 = arith.select %22, %25, %19 : vector<16x16xi1>, vector<16x16xf32>
    %c4 = arith.constant 4 : index
    %c0_12 = arith.constant 0 : index
    %c0_13 = arith.constant 0 : index
    %27 = vector.load %arg2[%c4, %c0_12, %c0_13] : memref<6x16x16xf32, #tpu.memory_space<vmem>>, vector<1x16x16xf32>
    %28 = vector.shape_cast %27 : vector<1x16x16xf32> to vector<16x16xf32>
    %29 = arith.cmpf ogt, %28, %23 : vector<16x16xf32>
    %30 = arith.select %29, %28, %23 : vector<16x16xi1>, vector<16x16xf32>
    %c4_14 = arith.constant 4 : index
    %31 = memref.load %arg1[%c4_14] : memref<6xf32, #tpu.memory_space<smem>>
    %32 = vector.broadcast %31 : f32 to vector<16x16xf32>
    %33 = arith.select %29, %32, %26 : vector<16x16xi1>, vector<16x16xf32>
    %c5 = arith.constant 5 : index
    %c0_15 = arith.constant 0 : index
    %c0_16 = arith.constant 0 : index
    %34 = vector.load %arg2[%c5, %c0_15, %c0_16] : memref<6x16x16xf32, #tpu.memory_space<vmem>>, vector<1x16x16xf32>
    %35 = vector.shape_cast %34 : vector<1x16x16xf32> to vector<16x16xf32>
    %36 = arith.cmpf ogt, %35, %30 : vector<16x16xf32>
    %c5_17 = arith.constant 5 : index
    %37 = memref.load %arg1[%c5_17] : memref<6xf32, #tpu.memory_space<smem>>
    %38 = vector.broadcast %37 : f32 to vector<16x16xf32>
    %39 = arith.select %36, %38, %33 : vector<16x16xi1>, vector<16x16xf32>
    %c0_18 = arith.constant 0 : index
    %c0_19 = arith.constant 0 : index
    %40 = vector.load %arg3[%c0_18, %c0_19] : memref<16x16xf32, #tpu.memory_space<vmem>>, vector<16x16xf32>
    %41 = arith.addf %39, %40 : vector<16x16xf32>
    %c0_20 = arith.constant 0 : index
    %c0_21 = arith.constant 0 : index
    %42 = vector.load %arg4[%c0_20, %c0_21] : memref<16x16xf32, #tpu.memory_space<vmem>>, vector<16x16xf32>
    tpu.vector_store %arg4[%c0_20, %c0_21], %41 {strides = array<i32>} : memref<16x16xf32, #tpu.memory_space<vmem>>, vector<16x16xf32>,
    return
  }
  func.func @transform_0(%arg0: i32) -> i32 {
    %c0_i32 = arith.constant 0 : i32
    %c0_i32_0 = arith.constant 0 : i32
    return %c0_i32 : i32
  }
  func.func @transform_1(%arg0: i32) -> (i32, i32, i32) {
    %c0_i32 = arith.constant 0 : i32
    %c0_i32_0 = arith.constant 0 : i32
    %c0_i32_1 = arith.constant 0 : i32
    return %c0_i32, %arg0, %c0_i32_0 : i32, i32, i32
  }
  func.func @transform_2(%arg0: i32) -> (i32, i32) {
    %c0_i32 = arith.constant 0 : i32
    %c0_i32_0 = arith.constant 0 : i32
    return %arg0, %c0_i32 : i32, i32
  }
  func.func @transform_3(%arg0: i32) -> (i32, i32) {
    %c0_i32 = arith.constant 0 : i32
    %c0_i32_0 = arith.constant 0 : i32
    return %arg0, %c0_i32 : i32, i32
  }
}

</mosaic_0001>

<bundles_post_ra>
// kernel: tpu_custom_call.1
= control target key start
LH: loop header
LB: loop body
LE: loop exit
PB: predicated region body
PF: predicated region fallthrough
CT: control target
= control target key end

     0   :  { %8 = vsyncpa [#allocation5], 0  ;;  %s299_s0 = inlined_call_operand.hbm [shape: f32[6], index: 0, kind: input, shape index: {}]   ;;  %s300_s1 = inlined_call_operand.hbm [shape: f32[6,16,16], index: 1, kind: input, shape index: {}]   ;;  %s301_s2 = inlined_call_operand.hbm [shape: f32[16,16], index: 2, kind: input, shape index: {}]   ;;  %s302_s3 = inlined_call_operand.hbm [shape: f32[16,16], index: 3, kind: output, shape index: {}]  }
   0x1   :  { %9 = vsyncpa [#allocation3], 0 }
   0x2   :  { %10 = vsyncpa [#allocation8], 0 }
   0x3   :  { %11 = vsyncpa [#allocation4], 0  ;;  %s225_s12 = smov [#allocation2]   ;;  %s226_s15 = smov [#allocation6]  }
   0x4   :  { %19 = dma.hbm_to_smem %s299_s0, 16, %s225_s12, [#allocation5]  }
   0x5   :  { %s25_s16 = sshll.u32 %s226_s15, 4  ;;  %s26_s16 = int_to_ptr.vmem [resolvable:$true] %s25_s16 }
   0x6   :  { %s165_s17 = scalar_lea.vmem %s26_s16, 1536  ;;  %p170_p1 = scmp.lt.s32.totalorder %s26_s16, %s26_s16 }
   0x7   :  { %p166_p0 = scmp.ne.s32.totalorder %s26_s16, %s165_s17  ;;  %p171_p2 = scmp.lt.s32.totalorder %s165_s17, %s165_s17 }
   0x9   :  { %p172_p3 = por %p171_p2, %p170_p1 }
   0xb   :  { %p173_p4 = pnand %p172_p3, %p166_p0 }
   0xd   :  { %176 = shalt.err (!%p173_p4)
}
   0xe   :  { %s227_s18 = smov 128   ;;  %s228_s19 = smov 8  }
   0xf   :  { %31 = dma.hbm_to_vmem [thread:$0]  %s300_s1, 1536, %s26_s16, [#allocation3], %s227_s18, %s227_s18, %s228_s19  }
  0x10   :  { %s229_s0 = smov [#allocation7]  }
  0x11   :  { %s37_s22 = sshll.u32 %s229_s0, 4  ;;  %s38_s22 = int_to_ptr.vmem [resolvable:$true] %s37_s22 }
  0x12   :  { %s185_s23 = scalar_lea.vmem %s38_s22, 256  ;;  %p190_p6 = scmp.lt.s32.totalorder %s38_s22, %s38_s22 }
  0x13   :  { %p186_p5 = scmp.ne.s32.totalorder %s38_s22, %s185_s23  ;;  %p191_p7 = scmp.lt.s32.totalorder %s185_s23, %s185_s23 }
  0x15   :  { %p192_p8 = por %p191_p7, %p190_p6 }
  0x17   :  { %p193_p9 = pnand %p192_p8, %p186_p5 }
  0x19   :  { %196 = shalt.err (!%p193_p9)
}
  0x1a   :  { %43 = dma.hbm_to_vmem [thread:$0]  %s301_s2, 256, %s38_s22, [#allocation8], %s227_s18, %s227_s18, %s228_s19  }
  0x1b   :  { %217 = dma.done.wait [#allocation5], 16  }
  0x1c   :  { %218 = vsyncadd [#allocation5], 4294967280 }
  0x1d   :  { %219 = dma.done.wait [#allocation3], 1536  }
  0x1e   :  { %220 = vsyncadd [#allocation3], 4294965760 }
  0x1f   :  { %221 = dma.done.wait [#allocation8], 256  }
  0x20   :  { %222 = vsyncadd [#allocation8], 4294967040 }
  0x21   :  { %53 = sfence }
  0x22   :  { %v54_v0 = vld [vmem:[#allocation6] sm:$0xff]  ;;  %s266_s1 = sld [smem:[#allocation2]]  ;;  %v60_v1 = vld [vmem:[#allocation6 + $0x10] sm:$0xff]  ;;  %v55_v5 = vld [vmem:[#allocation6 + $0x8] sm:$0xff]  ;;  %vm116_vm9 = vcmask 130048   ;;  %s230_s30 = smov [#allocation9]  }
  0x23   :  { %v71_v2 = vld [vmem:[#allocation6 + $0x20] sm:$0xff]  ;;  %vm62_vm0 = vcmp.gt.f32.partialorder %v60_v1, %v54_v0  ;;  %s138_s26 = sld [smem:[#allocation2 + $0x1]]  ;;  %v82_v4 = vld [vmem:[#allocation6 + $0x30] sm:$0xff]  ;;  %v61_v6 = vld [vmem:[#allocation6 + $0x18] sm:$0xff]  ;;  %s124_s4 = sshll.u32 %s230_s30, 4  ;;  %s125_s4 = int_to_ptr.vmem [resolvable:$true] %s124_s4 }
  0x24   :  { %v64_v3 = vsel %vm62_vm0, %v60_v1, %v54_v0  ;;  %s269_s27 = sld [smem:[#allocation2 + $0x2]]  ;;  %vm63_vm2 = vcmp.gt.f32.partialorder %v61_v6, %v55_v5  ;;  %v72_v7 = vld [vmem:[#allocation6 + $0x28] sm:$0xff]  ;;  %v93_v9 = vld [vmem:[#allocation6 + $0x40] sm:$0xff]  ;;  %v83_v11 = vld [vmem:[#allocation6 + $0x38] sm:$0xff]  ;;  %s197_s5 = scalar_lea.vmem %s125_s4, 256 }
  0x25   :  { %vm73_vm1 = vcmp.gt.f32.partialorder %v71_v2, %v64_v3  ;;  %s271_s2 = sld [smem:[#allocation2 + $0x3]]  ;;  %v65_v10 = vsel %vm63_vm2, %v61_v6, %v55_v5  ;;  %v104_v14 = vld [vmem:[#allocation6 + $0x50] sm:$0xff]  ;;  %v94_v21 = vld [vmem:[#allocation6 + $0x48] sm:$0xff]  ;;  %v112_v27 = vld [vmem:[#allocation7] sm:$0xff]  ;;  %p198_p10 = scmp.ne.s32.totalorder %s125_s4, %s197_s5 }
  0x26   :  { %v75_v8 = vsel %vm73_vm1, %v71_v2, %v64_v3  ;;  %s274_s28 = sld [smem:[#allocation2 + $0x4]]  ;;  %vm74_vm4 = vcmp.gt.f32.partialorder %v72_v7, %v65_v10  ;;  %v105_v30 = vld [vmem:[#allocation6 + $0x58] sm:$0xff]  ;;  %v113_v36 = vld [vmem:[#allocation7 + $0x8] sm:$0xff]  ;;  %p202_p11 = scmp.lt.s32.totalorder %s125_s4, %s125_s4 }
  0x27   :  { %vm84_vm3 = vcmp.gt.f32.partialorder %v82_v4, %v75_v8  ;;  %s277_s29 = sld [smem:[#allocation2 + $0x5]]  ;;  %v76_v15 = vsel %vm74_vm4, %v72_v7, %v65_v10  ;;  %p203_p12 = scmp.lt.s32.totalorder %s197_s5, %s197_s5 }
  0x28   :  { %v57_v12 = vstv %s266_s1  ;;  %v86_v13 = vsel %vm84_vm3, %v82_v4, %v75_v8  ;;  %vm85_vm6 = vcmp.gt.f32.partialorder %v83_v11, %v76_v15 }
  0x29   :  { %v67_v16 = vstv %s138_s26  ;;  %vm95_vm5 = vcmp.gt.f32.partialorder %v93_v9, %v86_v13  ;;  %v87_v28 = vsel %vm85_vm6, %v83_v11, %v76_v15  ;;  %p204_p13 = por %p203_p12, %p202_p11 }
  0x2a   :  { %v68_v17 = vsel %vm62_vm0, %v67_v16, %v57_v12  ;;  %v78_v18 = vstv %s269_s27  ;;  %v97_v19 = vsel %vm95_vm5, %v93_v9, %v86_v13  ;;  %v69_v20 = vsel %vm63_vm2, %v67_v16, %v57_v12 }
  0x2b   :  { %v79_v22 = vsel %vm73_vm1, %v78_v18, %v68_v17  ;;  %v89_v23 = vstv %s271_s2  ;;  %vm106_vm7 = vcmp.gt.f32.partialorder %v104_v14, %v97_v19  ;;  %v80_v24 = vsel %vm74_vm4, %v78_v18, %v69_v20  ;;  %p205_p0 = pnand %p204_p13, %p198_p10 }
  0x2c   :  { %v90_v25 = vsel %vm84_vm3, %v89_v23, %v79_v22  ;;  %v100_v26 = vstv %s274_s28  ;;  %v91_v29 = vsel %vm85_vm6, %v89_v23, %v80_v24  ;;  %vm96_vm8 = vcmp.gt.f32.partialorder %v94_v21, %v87_v28 }
  0x2d   :  { %v101_v31 = vsel %vm95_vm5, %v100_v26, %v90_v25  ;;  %v109_v32 = vstv %s277_s29  ;;  %v98_v34 = vsel %vm96_vm8, %v94_v21, %v87_v28  ;;  %v102_v35 = vsel %vm96_vm8, %v100_v26, %v91_v29 }
  0x2e   :  { %v110_v33 = vsel %vm106_vm7, %v109_v32, %v101_v31  ;;  %vm107_vm10 = vcmp.gt.f32.partialorder %v105_v30, %v98_v34 }
  0x2f   :  { %v114_v37 = vadd.f32 %v112_v27, %v110_v33  ;;  %v111_v38 = vsel %vm107_vm10, %v109_v32, %v102_v35 }
  0x30   :  { %v115_v39 = vadd.f32 %v113_v36, %v111_v38 }
  0x31   :  { %117 = vst.msk [vmem:[#allocation9] sm:$0xff] %vm116_vm9, %v114_v37 }
  0x32   :  { %118 = vst.msk [vmem:[#allocation9 + $0x8] sm:$0xff] %vm116_vm9, %v115_v39 }
  0x33   :  { %208 = shalt.err (!%p205_p0)
}
  0x34   :  { %130 = dma.vmem_to_hbm [thread:$0]  %s125_s4, 256, %s302_s3, [#allocation4], %s227_s18, %s227_s18, %s228_s19  }
  0x35   :  { %223 = dma.done.wait [#allocation4], 256  }
  0x36   :  { %224 = vsyncadd [#allocation4], 4294967040 }
  0x37   :  { %134 = vsyncpa [#allocation3], 1 }
  0x38   :  { %135 = vsyncpa [#allocation8], 1 }
  0x39   :  { %136 = vsyncpa [#allocation4], 1 }
  0x3a   :  { %137 = vsyncpa [#allocation5], 1 }

</bundles_post_ra>
